<compile_context>
chip_gen: v7x
topology: tpu7x:2x2x1
jax: 0.10.0
libtpu: 0.0.40
codegen_flags: <defaults>
</compile_context>

<pallas_src>
import math

import jax
import jax.numpy as jnp
from jax.experimental import pallas as pl
from jax.experimental.pallas import tpu as pltpu

NEG_SLOPE = 0.01  # torch.nn.LeakyReLU default

# Logical (PyTorch) dims.
D0, D1, D2, D3 = 784, 200, 200, 10
# Lane-padded *output* dims (multiples of 128).  Input dim of layer 1 stays 784.
D1P, D2P, D3P = 256, 256, 128

TILE_B_MAX = 2048  # max batch rows per grid step (see VMEM budget in header)
VMEM_LIMIT_BYTES = 32 * 1024 * 1024


def _leaky_relu(x):
    return jnp.maximum(x, NEG_SLOPE * x)


def _round_up(n, m):
    return ((n + m - 1) // m) * m


def mlp_kernel(x_ref, w1_ref, b1_ref, w2_ref, b2_ref, w3_ref, b3_ref, o_ref):
    # x streamed from HBM as f32 [tile_b, 784]; cast to bf16 in-kernel for the MXU.
    x = x_ref[...].astype(jnp.bfloat16)
    # Layer 1: [tile_b, 784](bf16) @ [784, 256](bf16) -> f32 acc, + bias, LeakyReLU.
    h = jnp.dot(x, w1_ref[...], preferred_element_type=jnp.float32)
    h = _leaky_relu(h + b1_ref[...])
    # Layer 2: [tile_b, 256] @ [256, 256]
    h = jnp.dot(h.astype(jnp.bfloat16), w2_ref[...], preferred_element_type=jnp.float32)
    h = _leaky_relu(h + b2_ref[...])
    # Layer 3: [tile_b, 256] @ [256, 128]  (lane-dense, unmasked bf16 store)
    h = jnp.dot(h.astype(jnp.bfloat16), w3_ref[...], preferred_element_type=jnp.float32)
    o_ref[...] = _leaky_relu(h + b3_ref[...]).astype(jnp.bfloat16)


def prepare_params(params):
    """One-time prep (hoisted out of the forward pass): zero-pad output dims to lane
    multiples and cast weights to bf16.  Biases stay f32."""
    w1, b1, w2, b2, w3, b3 = params
    w1p = jnp.pad(w1, ((0, 0), (0, D1P - D1))).astype(jnp.bfloat16)          # (784, 256)
    w2p = jnp.pad(w2, ((0, D1P - D1), (0, D2P - D2))).astype(jnp.bfloat16)   # (256, 256)
    w3p = jnp.pad(w3, ((0, D2P - D2), (0, D3P - D3))).astype(jnp.bfloat16)   # (256, 128)
    b1p = jnp.pad(b1, ((0, 0), (0, D1P - D1)))                               # (1, 256) f32
    b2p = jnp.pad(b2, ((0, 0), (0, D2P - D2)))                               # (1, 256) f32
    b3p = jnp.pad(b3, ((0, 0), (0, D3P - D3)))                               # (1, 128) f32
    return w1p, b1p, w2p, b2p, w3p, b3p


def _choose_tiling(batch):
    """Batch tile size + padded batch.  Even number of tiles (when there is enough work)
    so v7x's 2 TensorCores both get batch tiles; tile rows rounded to 16."""
    n_tiles = pl.cdiv(batch, TILE_B_MAX)
    if batch > 16:
        n_tiles = max(n_tiles, 2)
        n_tiles += n_tiles % 2  # even split balances the two TCs
    tile_b = _round_up(pl.cdiv(batch, n_tiles), 16)
    b_pad = _round_up(batch, tile_b)
    return tile_b, b_pad


def mlp_forward(x, padded_params):
    """x: [B, 784] f32.  padded_params: output of prepare_params()."""
    B = x.shape[0]
    w1p, b1p, w2p, b2p, w3p, b3p = padded_params

    tile_b, b_pad = _choose_tiling(B)
    grid = (b_pad // tile_b,)

    # Only batch padding (no feature pad, no dtype cast) — cheap / no-op when aligned.
    xp = jnp.pad(x, ((0, b_pad - B), (0, 0)))

    resident = lambda i: (0, 0)  # constant block index -> stays VMEM-resident
    in_specs = [
        pl.BlockSpec((tile_b, D0), lambda i: (i, 0)),   # full 784 last dim (== array dim)
        pl.BlockSpec((D0, D1P), resident),
        pl.BlockSpec((1, D1P), resident),
        pl.BlockSpec((D1P, D2P), resident),
        pl.BlockSpec((1, D2P), resident),
        pl.BlockSpec((D2P, D3P), resident),
        pl.BlockSpec((1, D3P), resident),
    ]
    out_spec = pl.BlockSpec((tile_b, D3P), lambda i: (i, 0))

    flops = 2 * b_pad * (D0 * D1P + D1P * D2P + D2P * D3P)
    weight_bytes = 2 * (D0 * D1P + D1P * D2P + D2P * D3P) + 4 * (D1P + D2P + D3P)
    bytes_accessed = b_pad * D0 * 4 + weight_bytes + b_pad * D3P * 2

    out = pl.pallas_call(
        mlp_kernel,
        out_shape=jax.ShapeDtypeStruct((b_pad, D3P), jnp.bfloat16),
        grid=grid,
        in_specs=in_specs,
        out_specs=out_spec,
        compiler_params=pltpu.CompilerParams(
            dimension_semantics=("parallel",),
            vmem_limit_bytes=VMEM_LIMIT_BYTES,
        ),
        cost_estimate=pl.CostEstimate(
            flops=flops, transcendentals=0, bytes_accessed=bytes_accessed),
    )(xp, w1p, b1p, w2p, b2p, w3p, b3p)

    # Layout plumbing only: drop batch padding / padded lanes, back to f32 for the caller.
    return out[:B, :D3].astype(jnp.float32)


def init_params(key):
    """Deterministic init mimicking torch.nn.Linear defaults: U(-1/sqrt(fan_in), .)."""
    sizes = [(D0, D1), (D1, D2), (D2, D3)]
    params = []
    for fan_in, fan_out in sizes:
        key, kw, kb = jax.random.split(key, 3)
        bound = 1.0 / math.sqrt(fan_in)
        w = jax.random.uniform(kw, (fan_in, fan_out), jnp.float32, -bound, bound)
        b = jax.random.uniform(kb, (1, fan_out), jnp.float32, -bound, bound)
        params += [w, b]
    return tuple(params)


def mlp_reference_f32(x, params):
    w1, b1, w2, b2, w3, b3 = params
    h = _leaky_relu(x @ w1 + b1)
    h = _leaky_relu(h @ w2 + b2)
    return _leaky_relu(h @ w3 + b3)


def mlp_reference_bf16(x, params):
    """Reference with the kernel's recipe: bf16 matmul inputs, f32 accumulation,
    f32 bias+activation, bf16 output store."""
    w1, b1, w2, b2, w3, b3 = params
    bf = jnp.bfloat16
    h = _leaky_relu(jnp.dot(x.astype(bf), w1.astype(bf),
                            preferred_element_type=jnp.float32) + b1)
    h = _leaky_relu(jnp.dot(h.astype(bf), w2.astype(bf),
                            preferred_element_type=jnp.float32) + b2)
    h = _leaky_relu(jnp.dot(h.astype(bf), w3.astype(bf),
                            preferred_element_type=jnp.float32) + b3)
    return h.astype(bf).astype(jnp.float32)


if __name__ == "__main__":
    key = jax.random.PRNGKey(0)
    key, kx = jax.random.split(key)
    batch = 8
    x = jax.random.normal(kx, (batch, D0), jnp.float32)

    params = init_params(key)
    padded_params = prepare_params(params)          # one-time prep, outside forward

    fwd = jax.jit(mlp_forward)
    out = jax.block_until_ready(fwd(x, padded_params))
    assert out.shape == (batch, D3)

    # Exact-recipe comparison (bf16 matmul inputs, f32 acc, bf16 output rounding).
    ref_bf16 = mlp_reference_bf16(x, params)
    assert jnp.allclose(out, ref_bf16, atol=1e-2, rtol=1e-2)

    # Loose sanity check against the pure-f32 reference (bf16 rounding only).
    ref_f32 = mlp_reference_f32(x, params)
    assert jnp.allclose(out, ref_f32, atol=5e-2, rtol=5e-2)

    print("KERNEL_OK")
</pallas_src>

<mosaic_0001>
module attributes {stable_mosaic.version = 11 : i64} {
  func.func @mlp_kernel(%arg0: i32, %arg1: memref<16x784xf32, #tpu.memory_space<vmem>>, %arg2: memref<784x256xbf16, #tpu.memory_space<vmem>>, %arg3: memref<1x256xf32, #tpu.memory_space<vmem>>, %arg4: memref<256x256xbf16, #tpu.memory_space<vmem>>, %arg5: memref<1x256xf32, #tpu.memory_space<vmem>>, %arg6: memref<256x128xbf16, #tpu.memory_space<vmem>>, %arg7: memref<1x128xf32, #tpu.memory_space<vmem>>, %arg8: memref<16x128xbf16, #tpu.memory_space<vmem>>) attributes {dimension_semantics = [#tpu.dimension_semantics<parallel>], iteration_bounds = array<i64: 1>, scalar_prefetch = 0 : i64, scratch_operands = 0 : i64, tpu.core_type = #tpu.core_type<tc>, window_params = [{transform_indices = @transform_0, window_bounds = array<i64: 16, 784>}, {pipeline_mode = #tpu.pipeline_mode<synchronous>, transform_indices = @transform_1, window_bounds = array<i64: 784, 256>}, {pipeline_mode = #tpu.pipeline_mode<synchronous>, transform_indices = @transform_2, window_bounds = array<i64: 1, 256>}, {pipeline_mode = #tpu.pipeline_mode<synchronous>, transform_indices = @transform_3, window_bounds = array<i64: 256, 256>}, {pipeline_mode = #tpu.pipeline_mode<synchronous>, transform_indices = @transform_4, window_bounds = array<i64: 1, 256>}, {pipeline_mode = #tpu.pipeline_mode<synchronous>, transform_indices = @transform_5, window_bounds = array<i64: 256, 128>}, {pipeline_mode = #tpu.pipeline_mode<synchronous>, transform_indices = @transform_6, window_bounds = array<i64: 1, 128>}, {transform_indices = @transform_7, window_bounds = array<i64: 16, 128>}]} {
    %c0 = arith.constant 0 : index
    %c0_0 = arith.constant 0 : index
    %0 = vector.load %arg1[%c0, %c0_0] : memref<16x784xf32, #tpu.memory_space<vmem>>, vector<16x784xf32>
    %1 = arith.truncf %0 : vector<16x784xf32> to vector<16x784xbf16>
    %c0_1 = arith.constant 0 : index
    %c0_2 = arith.constant 0 : index
    %2 = vector.load %arg2[%c0_1, %c0_2] : memref<784x256xbf16, #tpu.memory_space<vmem>>, vector<784x256xbf16>
    %cst = arith.constant dense<0.000000e+00> : vector<16x256xf32>
    %3 = tpu.matmul %1, %2, %cst {dimension_numbers = #tpu.dot_dimension_numbers<[1], [0], [0], [1], [0, 0, 1, 1], [], []>} : vector<16x784xbf16>, vector<784x256xbf16>, vector<16x256xf32> -> vector<16x256xf32>
    %c0_3 = arith.constant 0 : index
    %c0_4 = arith.constant 0 : index
    %4 = vector.load %arg3[%c0_3, %c0_4] : memref<1x256xf32, #tpu.memory_space<vmem>>, vector<1x256xf32>
    %5 = vector.broadcast %4 : vector<1x256xf32> to vector<16x256xf32>
    %6 = arith.addf %3, %5 : vector<16x256xf32>
    %cst_5 = arith.constant 0.00999999977 : f32
    %7 = vector.broadcast %cst_5 : f32 to vector<16x256xf32>
    %8 = arith.mulf %7, %6 : vector<16x256xf32>
    %9 = arith.maximumf %6, %8 : vector<16x256xf32>
    %10 = arith.truncf %9 : vector<16x256xf32> to vector<16x256xbf16>
    %c0_6 = arith.constant 0 : index
    %c0_7 = arith.constant 0 : index
    %11 = vector.load %arg4[%c0_6, %c0_7] : memref<256x256xbf16, #tpu.memory_space<vmem>>, vector<256x256xbf16>
    %cst_8 = arith.constant dense<0.000000e+00> : vector<16x256xf32>
    %12 = tpu.matmul %10, %11, %cst_8 {dimension_numbers = #tpu.dot_dimension_numbers<[1], [0], [0], [1], [0, 0, 1, 1], [], []>} : vector<16x256xbf16>, vector<256x256xbf16>, vector<16x256xf32> -> vector<16x256xf32>
    %c0_9 = arith.constant 0 : index
    %c0_10 = arith.constant 0 : index
    %13 = vector.load %arg5[%c0_9, %c0_10] : memref<1x256xf32, #tpu.memory_space<vmem>>, vector<1x256xf32>
    %14 = vector.broadcast %13 : vector<1x256xf32> to vector<16x256xf32>
    %15 = arith.addf %12, %14 : vector<16x256xf32>
    %cst_11 = arith.constant 0.00999999977 : f32
    %16 = vector.broadcast %cst_11 : f32 to vector<16x256xf32>
    %17 = arith.mulf %16, %15 : vector<16x256xf32>
    %18 = arith.maximumf %15, %17 : vector<16x256xf32>
    %19 = arith.truncf %18 : vector<16x256xf32> to vector<16x256xbf16>
    %c0_12 = arith.constant 0 : index
    %c0_13 = arith.constant 0 : index
    %20 = vector.load %arg6[%c0_12, %c0_13] : memref<256x128xbf16, #tpu.memory_space<vmem>>, vector<256x128xbf16>
    %cst_14 = arith.constant dense<0.000000e+00> : vector<16x128xf32>
    %21 = tpu.matmul %19, %20, %cst_14 {dimension_numbers = #tpu.dot_dimension_numbers<[1], [0], [0], [1], [0, 0, 1, 1], [], []>} : vector<16x256xbf16>, vector<256x128xbf16>, vector<16x128xf32> -> vector<16x128xf32>
    %c0_15 = arith.constant 0 : index
    %c0_16 = arith.constant 0 : index
    %22 = vector.load %arg7[%c0_15, %c0_16] : memref<1x128xf32, #tpu.memory_space<vmem>>, vector<1x128xf32>
    %23 = vector.broadcast %22 : vector<1x128xf32> to vector<16x128xf32>
    %24 = arith.addf %21, %23 : vector<16x128xf32>
    %cst_17 = arith.constant 0.00999999977 : f32
    %25 = vector.broadcast %cst_17 : f32 to vector<16x128xf32>
    %26 = arith.mulf %25, %24 : vector<16x128xf32>
    %27 = arith.maximumf %24, %26 : vector<16x128xf32>
    %28 = arith.truncf %27 : vector<16x128xf32> to vector<16x128xbf16>
    %c0_18 = arith.constant 0 : index
    %c0_19 = arith.constant 0 : index
    %29 = vector.load %arg8[%c0_18, %c0_19] : memref<16x128xbf16, #tpu.memory_space<vmem>>, vector<16x128xbf16>
    tpu.vector_store %arg8[%c0_18, %c0_19], %28 {strides = array<i32>} : memref<16x128xbf16, #tpu.memory_space<vmem>>, vector<16x128xbf16>,
    return
  }
  func.func @transform_0(%arg0: i32) -> (i32, i32) {
    %c0_i32 = arith.constant 0 : i32
    %c0_i32_0 = arith.constant 0 : i32
    return %arg0, %c0_i32 : i32, i32
  }
  func.func @transform_1(%arg0: i32) -> (i32, i32) {
    %c0_i32 = arith.constant 0 : i32
    %c0_i32_0 = arith.constant 0 : i32
    %c0_i32_1 = arith.constant 0 : i32
    return %c0_i32, %c0_i32_0 : i32, i32
  }
  func.func @transform_2(%arg0: i32) -> (i32, i32) {
    %c0_i32 = arith.constant 0 : i32
    %c0_i32_0 = arith.constant 0 : i32
    %c0_i32_1 = arith.constant 0 : i32
    return %c0_i32, %c0_i32_0 : i32, i32
  }
  func.func @transform_3(%arg0: i32) -> (i32, i32) {
    %c0_i32 = arith.constant 0 : i32
    %c0_i32_0 = arith.constant 0 : i32
    %c0_i32_1 = arith.constant 0 : i32
    return %c0_i32, %c0_i32_0 : i32, i32
  }
  func.func @transform_4(%arg0: i32) -> (i32, i32) {
    %c0_i32 = arith.constant 0 : i32
    %c0_i32_0 = arith.constant 0 : i32
    %c0_i32_1 = arith.constant 0 : i32
    return %c0_i32, %c0_i32_0 : i32, i32
  }
  func.func @transform_5(%arg0: i32) -> (i32, i32) {
    %c0_i32 = arith.constant 0 : i32
    %c0_i32_0 = arith.constant 0 : i32
    %c0_i32_1 = arith.constant 0 : i32
    return %c0_i32, %c0_i32_0 : i32, i32
  }
  func.func @transform_6(%arg0: i32) -> (i32, i32) {
    %c0_i32 = arith.constant 0 : i32
    %c0_i32_0 = arith.constant 0 : i32
    %c0_i32_1 = arith.constant 0 : i32
    return %c0_i32, %c0_i32_0 : i32, i32
  }
  func.func @transform_7(%arg0: i32) -> (i32, i32) {
    %c0_i32 = arith.constant 0 : i32
    %c0_i32_0 = arith.constant 0 : i32
    return %arg0, %c0_i32 : i32, i32
  }
}

</mosaic_0001>

<bundles_post_ra>
// kernel: mlp_forward.1
= control target key start
LH: loop header
LB: loop body
LE: loop exit
PB: predicated region body
PF: predicated region fallthrough
CT: control target
= control target key end

     0   :  { %12 = vsyncpa [#allocation3], 0  ;;  %s1949_s0 = inlined_call_operand.vmem [shape: f32[16,784], index: 0, kind: input, shape index: {}]   ;;  %s1950_s1 = inlined_call_operand.hbm [shape: bf16[784,256], index: 1, kind: input, shape index: {}]   ;;  %s1951_s2 = inlined_call_operand.vmem [shape: f32[1,256], index: 2, kind: input, shape index: {}]   ;;  %s1952_s3 = inlined_call_operand.hbm [shape: bf16[256,256], index: 3, kind: input, shape index: {}]   ;;  %s1953_s4 = inlined_call_operand.vmem [shape: f32[1,256], index: 4, kind: input, shape index: {}]   ;;  %s1954_s5 = inlined_call_operand.vmem [shape: bf16[256,128], index: 5, kind: input, shape index: {}]   ;;  %s1955_s6 = inlined_call_operand.vmem [shape: f32[1,128], index: 6, kind: input, shape index: {}]   ;;  %s1956_s7 = inlined_call_operand.vmem [shape: bf16[16,128], index: 7, kind: output, shape index: {}]  }
   0x1   :  { %13 = vsyncpa [#allocation5], 0  ;;  %s1774_s24 = smov [#allocation2]   ;;  %s1726_s28 = scalar_lea.hbm %s1950_s1, 12544 }
   0x2   :  { %s21_s25 = sshll.u32 %s1774_s24, 4  ;;  %p1727_p0 = scmp.ne.s32.totalorder %s1950_s1, %s1726_s28  ;;  %s22_s25 = int_to_ptr.vmem [resolvable:$true] %s21_s25 }
   0x3   :  { %p1730_p1 = scmp.lt.u32.totalorder %s1726_s28, %s1950_s1 }
   0x5   :  { %p1732_p2 = pnand %p1730_p1, %p1727_p0 }
   0x7   :  { %1735 = shalt.err (!%p1732_p2)
}
   0x8   :  { %s1736_s10 = scalar_lea.vmem %s22_s25, 12544  ;;  %p1741_p4 = scmp.lt.s32.totalorder %s22_s25, %s22_s25 }
   0x9   :  { %p1737_p3 = scmp.ne.s32.totalorder %s22_s25, %s1736_s10  ;;  %p1742_p5 = scmp.lt.s32.totalorder %s1736_s10, %s1736_s10 }
   0xb   :  { %p1743_p6 = por %p1742_p5, %p1741_p4 }
   0xd   :  { %p1744_p7 = pnand %p1743_p6, %p1737_p3 }
   0xf   :  { %1747 = shalt.err (!%p1744_p7)
}
  0x10   :  { %s1775_s11 = smov 128   ;;  %s1776_s12 = smov 8  }
  0x11   :  { %27 = dma.hbm_to_vmem [thread:$0]  %s1950_s1, 12544, %s22_s25, [#allocation3], %s1775_s11, %s1775_s11, %s1776_s12  }
  0x12   :  { %s1777_s15 = smov [#allocation4]   ;;  %s1748_s19 = scalar_lea.hbm %s1952_s3, 4096 }
  0x13   :  { %s35_s16 = sshll.u32 %s1777_s15, 4  ;;  %p1749_p8 = scmp.ne.s32.totalorder %s1952_s3, %s1748_s19  ;;  %s36_s16 = int_to_ptr.vmem [resolvable:$true] %s35_s16 }
  0x14   :  { %p1752_p9 = scmp.lt.u32.totalorder %s1748_s19, %s1952_s3 }
  0x16   :  { %p1754_p10 = pnand %p1752_p9, %p1749_p8 }
  0x18   :  { %1757 = shalt.err (!%p1754_p10)
}
  0x19   :  { %s1758_s24 = scalar_lea.vmem %s36_s16, 4096  ;;  %p1763_p12 = scmp.lt.s32.totalorder %s36_s16, %s36_s16 }
  0x1a   :  { %p1759_p11 = scmp.ne.s32.totalorder %s36_s16, %s1758_s24  ;;  %p1764_p13 = scmp.lt.s32.totalorder %s1758_s24, %s1758_s24 }
  0x1c   :  { %p1765_p0 = por %p1764_p13, %p1763_p12 }
  0x1e   :  { %p1766_p1 = pnand %p1765_p0, %p1759_p11 }
  0x20   :  { %1769 = shalt.err (!%p1766_p1)
}
  0x21   :  { %41 = dma.hbm_to_vmem [thread:$0]  %s1952_s3, 4096, %s36_s16, [#allocation5], %s1775_s11, %s1775_s11, %s1776_s12  }
  0x22   :  { %1770 = dma.done.wait [#allocation3], 12544  }
  0x23   :  { %1771 = vsyncadd [#allocation3], 4294954752 }
  0x24   :  { %1772 = dma.done.wait [#allocation5], 4096  }
  0x25   :  { %1773 = vsyncadd [#allocation5], 4294963200  ;;  %v1515_v0 = vld [vmem:[#allocation2 + $0x104] ss:$8 sps:$4 sm:$0xff]   ;;  %v1517_v1 = vld [vmem:[#allocation2 + $0x100] ss:$8 sps:$4 sm:$0xff]  }
  0x26   :  { %723 = vmatprep.subr.bf16.mxu0 %v1515_v0  ;;  %v1518_v2 = vld [vmem:[#allocation2 + $0x114] ss:$8 sps:$4 sm:$0xff]   ;;  %v1520_v3 = vld [vmem:[#allocation2 + $0x110] ss:$8 sps:$4 sm:$0xff]   ;;  %v1521_v4 = vld [vmem:[#allocation2 + $0x124] ss:$8 sps:$4 sm:$0xff]  }
  0x27   :  { %724 = vmatpush1.bf16.msra.mxu0 %v1517_v1  ;;  %v1523_v5 = vld [vmem:[#allocation2 + $0x120] ss:$8 sps:$4 sm:$0xff]   ;;  %v1524_v6 = vld [vmem:[#allocation2 + $0x134] ss:$8 sps:$4 sm:$0xff]   ;;  %v1526_v7 = vld [vmem:[#allocation2 + $0x130] ss:$8 sps:$4 sm:$0xff]  }
  0x28   :  { %725 = vmatprep.subr.bf16.mxu0 %v1518_v2  ;;  %v1527_v8 = vld [vmem:[#allocation2 + $0x144] ss:$8 sps:$4 sm:$0xff]   ;;  %v1529_v9 = vld [vmem:[#allocation2 + $0x140] ss:$8 sps:$4 sm:$0xff]   ;;  %v1530_v10 = vld [vmem:[#allocation2 + $0x154] ss:$8 sps:$4 sm:$0xff]  }
  0x29   :  { %v1532_v11 = vld [vmem:[#allocation2 + $0x150] ss:$8 sps:$4 sm:$0xff]   ;;  %v1533_v12 = vld [vmem:[#allocation2 + $0x164] ss:$8 sps:$4 sm:$0xff]   ;;  %v1535_v16 = vld [vmem:[#allocation2 + $0x160] ss:$8 sps:$4 sm:$0xff]  }
  0x2a   :  { %v58_v13 = vld [vmem:[%s1949_s0 + $0x18] sm:$0xff]  ;;  %v65_v14 = vld [vmem:[%s1949_s0 + $0x50] sm:$0xff]  ;;  %v1569_v18 = vld [vmem:[#allocation2 + $0x4] ss:$8 sps:$4 sm:$0xff]   ;;  %vm676_vm0 = vcmask 130048  }
  0x2b   :  { %726 = vmatpush1.bf16.msra.mxu0 %v1520_v3  ;;  %v72_v15 = vpack.c.bf16 %v65_v14, %v58_v13  ;;  %v1536_v17 = vld [vmem:[#allocation2 + $0x174] ss:$8 sps:$4 sm:$0xff]   ;;  %v1538_v19 = vld [vmem:[#allocation2 + $0x170] ss:$8 sps:$4 sm:$0xff]   ;;  %v1539_v20 = vld [vmem:[#allocation2 + $0x184] ss:$8 sps:$4 sm:$0xff]   ;;  %680 = vmatprep.subr.bf16.mxu1 %v1569_v18 }
  0x2c   :  { %727 = vmatprep.subr.bf16.mxu0 %v1521_v4  ;;  %v1574_v21 = vld [vmem:[#allocation2] ss:$8 sps:$4 sm:$0xff]   ;;  %v1575_v22 = vld [vmem:[#allocation2 + $0x14] ss:$8 sps:$4 sm:$0xff]   ;;  %v1580_v24 = vld [vmem:[#allocation2 + $0x10] ss:$8 sps:$4 sm:$0xff]  }
  0x2d   :  { %755 = vmatprep.mubr.bf16.mxu0 %v72_v15  ;;  %681 = vmatpush1.bf16.msra.mxu1 %v1574_v21  ;;  %v1541_v23 = vld [vmem:[#allocation2 + $0x180] ss:$8 sps:$4 sm:$0xff]   ;;  %v1581_v25 = vld [vmem:[#allocation2 + $0x24] ss:$8 sps:$4 sm:$0xff]   ;;  %v1542_v26 = vld [vmem:[#allocation2 + $0x194] ss:$8 sps:$4 sm:$0xff]  }
  0x2e   :  { %682 = vmatprep.subr.bf16.mxu1 %v1575_v22  ;;  %v1586_v27 = vld [vmem:[#allocation2 + $0x20] ss:$8 sps:$4 sm:$0xff]   ;;  %v1587_v28 = vld [vmem:[#allocation2 + $0x34] ss:$8 sps:$4 sm:$0xff]   ;;  %v1544_v29 = vld [vmem:[#allocation2 + $0x190] ss:$8 sps:$4 sm:$0xff]  }
  0x2f   :  { %728 = vmatpush1.bf16.msra.mxu0 %v1523_v5  ;;  %v1545_v30 = vld [vmem:[#allocation2 + $0x1a4] ss:$8 sps:$4 sm:$0xff]   ;;  %v1592_v31 = vld [vmem:[#allocation2 + $0x30] ss:$8 sps:$4 sm:$0xff]   ;;  %v1547_v33 = vld [vmem:[#allocation2 + $0x1a0] ss:$8 sps:$4 sm:$0xff]  }
  0x30   :  { %729 = vmatprep.subr.bf16.mxu0 %v1524_v6  ;;  %v1593_v32 = vld [vmem:[#allocation2 + $0x44] ss:$8 sps:$4 sm:$0xff]   ;;  %v1548_v34 = vld [vmem:[#allocation2 + $0x1b4] ss:$8 sps:$4 sm:$0xff]   ;;  %v1598_v35 = vld [vmem:[#allocation2 + $0x40] ss:$8 sps:$4 sm:$0xff]  }
  0x31   :  { %683 = vmatpush1.bf16.msra.mxu1 %v1580_v24  ;;  %v1599_v36 = vld [vmem:[#allocation2 + $0x54] ss:$8 sps:$4 sm:$0xff]   ;;  %v1550_v37 = vld [vmem:[#allocation2 + $0x1b0] ss:$8 sps:$4 sm:$0xff]   ;;  %v1551_v38 = vld [vmem:[#allocation2 + $0x1c4] ss:$8 sps:$4 sm:$0xff]  }
  0x32   :  { %684 = vmatprep.subr.bf16.mxu1 %v1581_v25  ;;  %v1604_v39 = vld [vmem:[#allocation2 + $0x50] ss:$8 sps:$4 sm:$0xff]   ;;  %v1605_v40 = vld [vmem:[#allocation2 + $0x64] ss:$8 sps:$4 sm:$0xff]   ;;  %v1553_v41 = vld [vmem:[#allocation2 + $0x1c0] ss:$8 sps:$4 sm:$0xff]  }
  0x33   :  { %730 = vmatpush1.bf16.msra.mxu0 %v1526_v7  ;;  %v1554_v42 = vld [vmem:[#allocation2 + $0x1d4] ss:$8 sps:$4 sm:$0xff]   ;;  %v1610_v43 = vld [vmem:[#allocation2 + $0x60] ss:$8 sps:$4 sm:$0xff]   ;;  %v1556_v45 = vld [vmem:[#allocation2 + $0x1d0] ss:$8 sps:$4 sm:$0xff]  }
  0x34   :  { %731 = vmatprep.subr.bf16.mxu0 %v1527_v8  ;;  %v1611_v44 = vld [vmem:[#allocation2 + $0x74] ss:$8 sps:$4 sm:$0xff]   ;;  %v1557_v46 = vld [vmem:[#allocation2 + $0x1e4] ss:$8 sps:$4 sm:$0xff]   ;;  %v1616_v47 = vld [vmem:[#allocation2 + $0x70] ss:$8 sps:$4 sm:$0xff]  }
  0x35   :  { %685 = vmatpush1.bf16.msra.mxu1 %v1586_v27  ;;  %v1617_v48 = vld [vmem:[#allocation2 + $0x84] ss:$8 sps:$4 sm:$0xff]   ;;  %v1559_v49 = vld [vmem:[#allocation2 + $0x1e0] ss:$8 sps:$4 sm:$0xff]   ;;  %v1560_v50 = vld [vmem:[#allocation2 + $0x1f4] ss:$8 sps:$4 sm:$0xff]  }
  0x36   :  { %686 = vmatprep.subr.bf16.mxu1 %v1587_v28  ;;  %v1622_v51 = vld [vmem:[#allocation2 + $0x80] ss:$8 sps:$4 sm:$0xff]   ;;  %v1623_v52 = vld [vmem:[#allocation2 + $0x94] ss:$8 sps:$4 sm:$0xff]   ;;  %v1562_v53 = vld [vmem:[#allocation2 + $0x1f0] ss:$8 sps:$4 sm:$0xff]  }
  0x37   :  { %732 = vmatpush1.bf16.msra.mxu0 %v1529_v9  ;;  %v57_v54 = vld [vmem:[%s1949_s0 + $0x10] sm:$0xff]  ;;  %v64_v55 = vld [vmem:[%s1949_s0 + $0x48] sm:$0xff]  ;;  %v67_v62 = vld [vmem:[%s1949_s0 + $0x60] sm:$0xff] }
  0x38   :  { %733 = vmatprep.subr.bf16.mxu0 %v1530_v10  ;;  %v1565_v56 = vld [vmem:[#allocation2 + $0x204] ss:$8 sps:$4 sm:$0xff]   ;;  %v1628_v57 = vld [vmem:[#allocation2 + $0x90] ss:$8 sps:$4 sm:$0xff]   ;;  %v1563_v58 = vld [vmem:[#allocation2 + $0x200] ss:$8 sps:$4 sm:$0xff]   ;;  %v71_v59 = vpack.c.bf16 %v64_v55, %v57_v54 }
  0x39   :  { %687 = vmatpush1.bf16.msra.mxu1 %v1592_v31  ;;  %v1629_v60 = vld [vmem:[#allocation2 + $0xa4] ss:$8 sps:$4 sm:$0xff]   ;;  %v1568_v63 = vld [vmem:[#allocation2 + $0x214] ss:$8 sps:$4 sm:$0xff]   ;;  %v1634_v1 = vld [vmem:[#allocation2 + $0xa0] ss:$8 sps:$4 sm:$0xff]  }
  0x3a   :  { %688 = vmatprep.subr.bf16.mxu1 %v1593_v32  ;;  %v60_v61 = vld [vmem:[%s1949_s0 + $0x28] sm:$0xff]  ;;  %v1635_v2 = vld [vmem:[#allocation2 + $0xb4] ss:$8 sps:$4 sm:$0xff]   ;;  %v1566_v3 = vld [vmem:[#allocation2 + $0x210] ss:$8 sps:$4 sm:$0xff]  }
  0x3b   :  { %734 = vmatpush1.bf16.msra.mxu0 %v1532_v11  ;;  %v74_v0 = vpack.c.bf16 %v67_v62, %v60_v61  ;;  %v1573_v4 = vld [vmem:[#allocation2 + $0x224] ss:$8 sps:$4 sm:$0xff]   ;;  %v1640_v7 = vld [vmem:[#allocation2 + $0xb0] ss:$8 sps:$4 sm:$0xff]   ;;  %v1571_v10 = vld [vmem:[#allocation2 + $0x220] ss:$8 sps:$4 sm:$0xff]  }
  0x3c   :  { %735 = vmatprep.subr.bf16.mxu0 %v1533_v12  ;;  %v56_v5 = vld [vmem:[%s1949_s0 + $0x8] sm:$0xff]  ;;  %v63_v6 = vld [vmem:[%s1949_s0 + $0x40] sm:$0xff]  ;;  %v1579_v11 = vld [vmem:[#allocation2 + $0x234] ss:$8 sps:$4 sm:$0xff]  }
  0x3d   :  { %689 = vmatpush1.bf16.msra.mxu1 %v1598_v35  ;;  %v70_v8 = vpack.c.bf16 %v63_v6, %v56_v5  ;;  %v1641_v9 = vld [vmem:[#allocation2 + $0xc4] ss:$8 sps:$4 sm:$0xff]   ;;  %v1646_v12 = vld [vmem:[#allocation2 + $0xc0] ss:$8 sps:$4 sm:$0xff]   ;;  %v1647_v13 = vld [vmem:[#allocation2 + $0xd4] ss:$8 sps:$4 sm:$0xff]  }
  0x3e   :  { %690 = vmatprep.subr.bf16.mxu1 %v1599_v36  ;;  %v1577_v14 = vld [vmem:[#allocation2 + $0x230] ss:$8 sps:$4 sm:$0xff]   ;;  %v1585_v15 = vld [vmem:[#allocation2 + $0x244] ss:$8 sps:$4 sm:$0xff]   ;;  %v1583_v18 = vld [vmem:[#allocation2 + $0x240] ss:$8 sps:$4 sm:$0xff]  }
  0x3f   :  { %736 = vmatpush1.bf16.msra.mxu0 %v1535_v16  ;;  %712 = vmatprep.mubr.bf16.mxu1 %v70_v8  ;;  %v1652_v16 = vld [vmem:[#allocation2 + $0xd0] ss:$8 sps:$4 sm:$0xff]   ;;  %v1659_v21 = vld [vmem:[#allocation2 + $0xf4] ss:$8 sps:$4 sm:$0xff]   ;;  %v1595_v25 = vld [vmem:[#allocation2 + $0x260] ss:$8 sps:$4 sm:$0xff]  }
  0x40   :  { %737 = vmatprep.subr.bf16.mxu0 %v1536_v17  ;;  %v1653_v17 = vld [vmem:[#allocation2 + $0xe4] ss:$8 sps:$4 sm:$0xff]   ;;  %v1589_v22 = vld [vmem:[#allocation2 + $0x250] ss:$8 sps:$4 sm:$0xff]   ;;  %v1603_v28 = vld [vmem:[#allocation2 + $0x274] ss:$8 sps:$4 sm:$0xff]  }
  0x41   :  { %691 = vmatpush1.bf16.msra.mxu1 %v1604_v39  ;;  %v1661_v24 = vld [vmem:[#allocation2 + $0xf0] ss:$8 sps:$4 sm:$0xff]   ;;  %v1667_v32 = vld [vmem:[#allocation4 + $0x14] ss:$8 sps:$4 sm:$0xff]   ;;  %v1665_v35 = vld [vmem:[#allocation4 + $0x10] ss:$8 sps:$4 sm:$0xff]  }
  0x42   :  { %692 = vmatprep.subr.bf16.mxu1 %v1605_v40  ;;  %v62_v27 = vld [vmem:[%s1949_s0 + $0x38] sm:$0xff]  ;;  %v1673_v40 = vld [vmem:[#allocation4 + $0x34] ss:$8 sps:$4 sm:$0xff]   ;;  %v1643_v61 = vld [vmem:[#allocation2 + $0x2e0] ss:$8 sps:$4 sm:$0xff]  }
  0x43   :  { %738 = vmatpush1.bf16.msra.mxu0 %v1538_v19  ;;  %v1591_v19 = vld [vmem:[#allocation2 + $0x254] ss:$8 sps:$4 sm:$0xff]   ;;  %v1668_v39 = vld [vmem:[#allocation4 + $0x20] ss:$8 sps:$4 sm:$0xff]   ;;  %v1689_v5 = vld [vmem:[#allocation4 + $0x90] ss:$8 sps:$4 sm:$0xff]  }
  0x44   :  { %739 = vmatprep.subr.bf16.mxu0 %v1539_v20  ;;  %v1658_v20 = vld [vmem:[#allocation2 + $0xe0] ss:$8 sps:$4 sm:$0xff]   ;;  %v1670_v36 = vld [vmem:[#allocation4 + $0x24] ss:$8 sps:$4 sm:$0xff]   ;;  %v1680_v55 = vld [vmem:[#allocation4 + $0x60] ss:$8 sps:$4 sm:$0xff]  }
  0x45   :  { %693 = vmatpush1.bf16.msra.mxu1 %v1610_v43  ;;  %v1671_v43 = vld [vmem:[#allocation4 + $0x30] ss:$8 sps:$4 sm:$0xff]   ;;  %v1639_v54 = vld [vmem:[#allocation2 + $0x2d4] ss:$8 sps:$4 sm:$0xff]  }
  0x46   :  { %694 = vmatprep.subr.bf16.mxu1 %v1611_v44  ;;  %v1676_v44 = vld [vmem:[#allocation4 + $0x44] ss:$8 sps:$4 sm:$0xff]   ;;  %v1655_v8 = vld [vmem:[#allocation2 + $0x300] ss:$8 sps:$4 sm:$0xff]  }
  0x47   :  { %740 = vmatpush1.bf16.msra.mxu0 %v1541_v23  ;;  %v1597_v23 = vld [vmem:[#allocation2 + $0x264] ss:$8 sps:$4 sm:$0xff]   ;;  %v1651_v62 = vld [vmem:[#allocation2 + $0x2f4] ss:$8 sps:$4 sm:$0xff]  }
  0x48   :  { %741 = vmatprep.subr.bf16.mxu0 %v1542_v26  ;;  %v55_v26 = vld [vmem:[%s1949_s0] sm:$0xff] }
  0x49   :  { %695 = vmatpush1.bf16.msra.mxu1 %v1616_v47  ;;  %v69_v31 = vpack.c.bf16 %v62_v27, %v55_v26  ;;  %v1674_v47 = vld [vmem:[#allocation4 + $0x40] ss:$8 sps:$4 sm:$0xff]  }
  0x4a   :  { %696 = vmatprep.subr.bf16.mxu1 %v1617_v48  ;;  %v1679_v48 = vld [vmem:[#allocation4 + $0x54] ss:$8 sps:$4 sm:$0xff]  }
  0x4b   :  { %742 = vmatpush1.bf16.msra.mxu0 %v1544_v29  ;;  %v1664_v29 = vld [vmem:[#allocation4 + $0x4] ss:$8 sps:$4 sm:$0xff]  }
  0x4c   :  { %743 = vmatprep.subr.bf16.mxu0 %v1545_v30  ;;  %v1662_v30 = vld [vmem:[#allocation4] ss:$8 sps:$4 sm:$0xff]  }
  0x4d   :  { %697 = vmatpush1.bf16.msra.mxu1 %v1622_v51  ;;  %v1677_v51 = vld [vmem:[#allocation4 + $0x50] ss:$8 sps:$4 sm:$0xff]  }
  0x4e   :  { %698 = vmatprep.subr.bf16.mxu1 %v1623_v52  ;;  %v1682_v52 = vld [vmem:[#allocation4 + $0x64] ss:$8 sps:$4 sm:$0xff]  }
  0x4f   :  { %744 = vmatpush1.bf16.msra.mxu0 %v1547_v33  ;;  %v1601_v33 = vld [vmem:[#allocation2 + $0x270] ss:$8 sps:$4 sm:$0xff]  }
  0x50   :  { %745 = vmatprep.subr.bf16.mxu0 %v1548_v34  ;;  %v1609_v34 = vld [vmem:[#allocation2 + $0x284] ss:$8 sps:$4 sm:$0xff]  }
  0x51   :  { %699 = vmatpush1.bf16.msra.mxu1 %v1628_v57  ;;  %v1637_v57 = vld [vmem:[#allocation2 + $0x2d0] ss:$8 sps:$4 sm:$0xff]  }
  0x52   :  { %700 = vmatprep.subr.bf16.mxu1 %v1629_v60  ;;  %v1688_v60 = vld [vmem:[#allocation4 + $0x84] ss:$8 sps:$4 sm:$0xff]  }
  0x53   :  { %746 = vmatpush1.bf16.msra.mxu0 %v1550_v37  ;;  %v1607_v37 = vld [vmem:[#allocation2 + $0x280] ss:$8 sps:$4 sm:$0xff]  }
  0x54   :  { %747 = vmatprep.subr.bf16.mxu0 %v1551_v38  ;;  %v1615_v38 = vld [vmem:[#allocation2 + $0x294] ss:$8 sps:$4 sm:$0xff]  }
  0x55   :  { %701 = vmatpush1.bf16.msra.mxu1 %v1634_v1  ;;  %v1649_v1 = vld [vmem:[#allocation2 + $0x2f0] ss:$8 sps:$4 sm:$0xff]  }
  0x56   :  { %702 = vmatprep.subr.bf16.mxu1 %v1635_v2  ;;  %v59_v2 = vld [vmem:[%s1949_s0 + $0x20] sm:$0xff] }
  0x57   :  { %748 = vmatpush1.bf16.msra.mxu0 %v1553_v41  ;;  %v1613_v41 = vld [vmem:[#allocation2 + $0x290] ss:$8 sps:$4 sm:$0xff]  }
  0x58   :  { %749 = vmatprep.subr.bf16.mxu0 %v1554_v42  ;;  %v1621_v42 = vld [vmem:[#allocation2 + $0x2a4] ss:$8 sps:$4 sm:$0xff]  }
  0x59   :  { %703 = vmatpush1.bf16.msra.mxu1 %v1640_v7  ;;  %v1694_v7 = vld [vmem:[#allocation4 + $0xa4] ss:$8 sps:$4 sm:$0xff]  }
  0x5a   :  { %704 = vmatprep.subr.bf16.mxu1 %v1641_v9  ;;  %v1692_v9 = vld [vmem:[#allocation4 + $0xa0] ss:$8 sps:$4 sm:$0xff]  }
  0x5b   :  { %750 = vmatpush1.bf16.msra.mxu0 %v1556_v45  ;;  %v1619_v45 = vld [vmem:[#allocation2 + $0x2a0] ss:$8 sps:$4 sm:$0xff]  }
  0x5c   :  { %751 = vmatprep.subr.bf16.mxu0 %v1557_v46  ;;  %v1627_v46 = vld [vmem:[#allocation2 + $0x2b4] ss:$8 sps:$4 sm:$0xff]  }
  0x5d   :  { %705 = vmatpush1.bf16.msra.mxu1 %v1646_v12  ;;  %v1695_v12 = vld [vmem:[#allocation4 + $0xb0] ss:$8 sps:$4 sm:$0xff]  }
  0x5e   :  { %706 = vmatprep.subr.bf16.mxu1 %v1647_v13  ;;  %v61_v13 = vld [vmem:[%s1949_s0 + $0x30] sm:$0xff] }
  0x5f   :  { %752 = vmatpush1.bf16.msra.mxu0 %v1559_v49  ;;  %v1625_v49 = vld [vmem:[#allocation2 + $0x2b0] ss:$8 sps:$4 sm:$0xff]  }
  0x60   :  { %753 = vmatprep.subr.bf16.mxu0 %v1560_v50  ;;  %v1633_v50 = vld [vmem:[#allocation2 + $0x2c4] ss:$8 sps:$4 sm:$0xff]  }
  0x61   :  { %707 = vmatpush1.bf16.msra.mxu1 %v1652_v16  ;;  %v1698_v16 = vld [vmem:[#allocation4 + $0xc0] ss:$8 sps:$4 sm:$0xff]  }
  0x62   :  { %708 = vmatprep.subr.bf16.mxu1 %v1653_v17  ;;  %v1700_v17 = vld [vmem:[#allocation4 + $0xc4] ss:$8 sps:$4 sm:$0xff]  }
  0x63   :  { %754 = vmatpush1.bf16.msra.mxu0 %v1562_v53  ;;  %v1631_v53 = vld [vmem:[#allocation2 + $0x2c0] ss:$8 sps:$4 sm:$0xff]  }
  0x64   :  { %766 = vmatprep.subr.bf16.mxu0 %v1565_v56  ;;  %v1685_v56 = vld [vmem:[#allocation4 + $0x74] ss:$8 sps:$4 sm:$0xff]  }
  0x65   :  { %709 = vmatpush1.bf16.msra.mxu1 %v1658_v20  ;;  %v1706_v20 = vld [vmem:[#allocation4 + $0xe4] ss:$8 sps:$4 sm:$0xff]  }
  0x66   :  { %756 = vmatmul.mubr.bf16.vlgmr.msra.gmra.mrb[0].mxu0 %v71_v59  ;;  %710 = vmatprep.subr.bf16.mxu1 %v1659_v21  ;;  %v1683_v59 = vld [vmem:[#allocation4 + $0x70] ss:$8 sps:$4 sm:$0xff]   ;;  %v1704_v21 = vld [vmem:[#allocation4 + $0xe0] ss:$8 sps:$4 sm:$0xff]  }
  0x67   :  { %767 = vmatpush1.bf16.msra.mxu0 %v1563_v58  ;;  %798 = vmatprep.mubr.bf16.mxu0 %v74_v0  ;;  %v1645_v58 = vld [vmem:[#allocation2 + $0x2e4] ss:$8 sps:$4 sm:$0xff]  }
  0x68   :  { %768 = vmatprep.subr.bf16.mxu0 %v1568_v63  ;;  %v1686_v63 = vld [vmem:[#allocation4 + $0x80] ss:$8 sps:$4 sm:$0xff]   ;;  %v1691_v0 = vld [vmem:[#allocation4 + $0x94] ss:$8 sps:$4 sm:$0xff]  }
  0x69   :  { %711 = vmatpush1.bf16.msra.mxu1 %v1661_v24  ;;  %v1710_v24 = vld [vmem:[%s1954_s5 + $0x40] sm:$0xff]  }
  0x6a   :  { %1066 = vmatprep.subr.bf16.mxu1 %v1664_v29  ;;  %v176_v29 = vlaneseq }
  0x6b   :  { %769 = vmatpush1.bf16.msra.mxu0 %v1566_v3  ;;  %v66_v3 = vld [vmem:[%s1949_s0 + $0x58] sm:$0xff] }
  0x6c   :  { %770 = vmatprep.subr.bf16.mxu0 %v1573_v4  ;;  %713 = vmatmul.mubr.bf16.vlgmr.msra.gmra.mrb[0].mxu1 %v69_v31  ;;  %v1657_v4 = vld [vmem:[#allocation2 + $0x304] ss:$8 sps:$4 sm:$0xff]   ;;  %v73_v6 = vpack.c.bf16 %v66_v3, %v59_v2 }
  0x6d   :  { %1067 = vmatpush1.bf16.msra.mxu1 %v1662_v30  ;;  %v1888_v30 = vshrl.u32 %v176_v29, 7  ;;  %v1719_v2 = vld [vmem:[%s1954_s5 + $0x20] sm:$0xff]   ;;  %v1720_v3 = vld [vmem:[%s1954_s5 + $0x68] sm:$0xff]  }
  0x6e   :  { %1068 = vmatprep.subr.bf16.mxu1 %v1667_v32  ;;  %v174_v32 = vld [vmem:[%s1951_s2] sm:$0x3] }
  0x6f   :  { %771 = vmatpush1.bf16.msra.mxu0 %v1571_v10  ;;  %v1697_v10 = vld [vmem:[#allocation4 + $0xb4] ss:$8 sps:$4 sm:$0xff]   ;;  %v178_v31 = vsub.s32 0, %v1888_v30 }
  0x70   :  { %772 = vmatprep.subr.bf16.mxu0 %v1579_v11  ;;  %v1778_v11 = vmov 0  }
  0x71   :  { %1069 = vmatpush1.bf16.msra.mxu1 %v1665_v35 }
  0x72   :  { %1070 = vmatprep.subr.bf16.mxu1 %v1670_v36 }
  0x73   :  { %773 = vmatpush1.bf16.msra.mxu0 %v1577_v14  ;;  %v68_v14 = vld [vmem:[%s1949_s0 + $0x68] sm:$0xff] }
  0x74   :  { %774 = vmatprep.subr.bf16.mxu0 %v1585_v15  ;;  %v75_v15 = vpack.c.bf16 %v68_v14, %v61_v13 }
  0x75   :  { %1071 = vmatpush1.bf16.msra.mxu1 %v1668_v39 }
  0x76   :  { %1072 = vmatprep.subr.bf16.mxu1 %v1673_v40 }
  0x77   :  { %775 = vmatpush1.bf16.msra.mxu0 %v1583_v18  ;;  %v1703_v18 = vld [vmem:[#allocation4 + $0xd4] ss:$8 sps:$4 sm:$0xff]  }
  0x78   :  { %776 = vmatprep.subr.bf16.mxu0 %v1591_v19  ;;  %v1701_v19 = vld [vmem:[#allocation4 + $0xd0] ss:$8 sps:$4 sm:$0xff]  }
  0x79   :  { %1073 = vmatpush1.bf16.msra.mxu1 %v1671_v43 }
  0x7a   :  { %1074 = vmatprep.subr.bf16.mxu1 %v1676_v44 }
  0x7b   :  { %777 = vmatpush1.bf16.msra.mxu0 %v1589_v22  ;;  %v1709_v22 = vld [vmem:[#allocation4 + $0xf4] ss:$8 sps:$4 sm:$0xff]  }
  0x7c   :  { %778 = vmatprep.subr.bf16.mxu0 %v1597_v23  ;;  %v1707_v23 = vld [vmem:[#allocation4 + $0xf0] ss:$8 sps:$4 sm:$0xff]  }
  0x7d   :  { %1075 = vmatpush1.bf16.msra.mxu1 %v1674_v47 }
  0x7e   :  { %1076 = vmatprep.subr.bf16.mxu1 %v1679_v48 }
  0x7f   :  { %779 = vmatpush1.bf16.msra.mxu0 %v1595_v25 }
  0x80   :  { %780 = vmatprep.subr.bf16.mxu0 %v1603_v28 }
  0x81   :  { %1077 = vmatpush1.bf16.msra.mxu1 %v1677_v51 }
  0x82   :  { %1078 = vmatprep.subr.bf16.mxu1 %v1682_v52 }
  0x83   :  { %781 = vmatpush1.bf16.msra.mxu0 %v1601_v33  ;;  %v182_v33 = vsub.s32 1, %v1888_v30 }
  0x84   :  { %782 = vmatprep.subr.bf16.mxu0 %v1609_v34  ;;  %v179_v34 = vrot.slane %v174_v32, %v178_v31 }
  0x85   :  { %1079 = vmatpush1.bf16.msra.mxu1 %v1680_v55  ;;  %v183_v35 = vrot.slane %v174_v32, %v182_v33 }
  0x86   :  { %1080 = vmatprep.subr.bf16.mxu1 %v1685_v56 }
  0x87   :  { %783 = vmatpush1.bf16.msra.mxu0 %v1607_v37 }
  0x88   :  { %784 = vmatprep.subr.bf16.mxu0 %v1615_v38 }
  0x89   :  { %1081 = vmatpush1.bf16.msra.mxu1 %v1683_v59  ;;  %v1712_v59 = vld [vmem:[%s1954_s5 + $0x48] sm:$0xff]  }
  0x8a   :  { %1082 = vmatprep.subr.bf16.mxu1 %v1688_v60  ;;  %v1713_v60 = vld [vmem:[%s1954_s5 + $0x8] sm:$0xff]  }
  0x8b   :  { %785 = vmatpush1.bf16.msra.mxu0 %v1613_v41 }
  0x8c   :  { %786 = vmatprep.subr.bf16.mxu0 %v1621_v42 }
  0x8d   :  { %1083 = vmatpush1.bf16.msra.mxu1 %v1686_v63  ;;  %v1716_v63 = vld [vmem:[%s1954_s5 + $0x58] sm:$0xff]  }
  0x8e   :  { %1084 = vmatprep.subr.bf16.mxu1 %v1691_v0  ;;  %v1717_v0 = vld [vmem:[%s1954_s5 + $0x18] sm:$0xff]  }
  0x8f   :  { %787 = vmatpush1.bf16.msra.mxu0 %v1619_v45 }
  0x90   :  { %788 = vmatprep.subr.bf16.mxu0 %v1627_v46 }
  0x91   :  { %1085 = vmatpush1.bf16.msra.mxu1 %v1689_v5  ;;  %v1722_v5 = vld [vmem:[%s1954_s5 + $0x70] sm:$0xff]  }
  0x92   :  { %1086 = vmatprep.subr.bf16.mxu1 %v1694_v7  ;;  %v1724_v7 = vld [vmem:[%s1954_s5 + $0x78] sm:$0xff]  }
  0x93   :  { %789 = vmatpush1.bf16.msra.mxu0 %v1625_v49 }
  0x94   :  { %790 = vmatprep.subr.bf16.mxu0 %v1633_v50 }
  0x95   :  { %1087 = vmatpush1.bf16.msra.mxu1 %v1692_v9  ;;  %v894_v9 = vld [vmem:[%s1953_s4] sm:$0x3] }
  0x96   :  { %1088 = vmatprep.subr.bf16.mxu1 %v1697_v10  ;;  %v899_v10 = vrot.slane %v894_v9, %v178_v31  ;;  %v1446_v31 = vld [vmem:[%s1955_s6] ss:$0 sm:$0xff] }
  0x97   :  { %791 = vmatpush1.bf16.msra.mxu0 %v1631_v53 }
  0x98   :  { %792 = vmatprep.subr.bf16.mxu0 %v1639_v54 }
  0x99   :  { %1089 = vmatpush1.bf16.msra.mxu1 %v1695_v12 }
  0x9a   :  { %1090 = vmatprep.subr.bf16.mxu1 %v1700_v17 }
  0x9b   :  { %793 = vmatpush1.bf16.msra.mxu0 %v1637_v57 }
  0x9c   :  { %794 = vmatprep.subr.bf16.mxu0 %v1645_v58  ;;  %v1711_v58 = vld [vmem:[%s1954_s5] sm:$0xff]  }
  0x9d   :  { %1091 = vmatpush1.bf16.msra.mxu1 %v1698_v16 }
  0x9e   :  { %1092 = vmatprep.subr.bf16.mxu1 %v1703_v18 }
  0x9f   :  { %795 = vmatpush1.bf16.msra.mxu0 %v1643_v61  ;;  %v1714_v61 = vld [vmem:[%s1954_s5 + $0x50] sm:$0xff]  }
  0xa0   :  { %796 = vmatprep.subr.bf16.mxu0 %v1651_v62  ;;  %v1715_v62 = vld [vmem:[%s1954_s5 + $0x10] sm:$0xff]  }
  0xa1   :  { %1093 = vmatpush1.bf16.msra.mxu1 %v1701_v19 }
  0xa2   :  { %1094 = vmatprep.subr.bf16.mxu1 %v1706_v20 }
  0xa3   :  { %797 = vmatpush1.bf16.msra.mxu0 %v1649_v1  ;;  %v1718_v1 = vld [vmem:[%s1954_s5 + $0x60] sm:$0xff]  }
  0xa4   :  { %809 = vmatprep.subr.bf16.mxu0 %v1657_v4  ;;  %v1721_v4 = vld [vmem:[%s1954_s5 + $0x28] sm:$0xff]  }
  0xa5   :  { %1095 = vmatpush1.bf16.msra.mxu1 %v1704_v21 }
  0xa6   :  { %799 = vmatmul.mubr.bf16.vlgmr.msra.gmra.mrb[0].mxu0 %v73_v6  ;;  %1096 = vmatprep.subr.bf16.mxu1 %v1709_v22  ;;  %v1723_v6 = vld [vmem:[%s1954_s5 + $0x30] sm:$0xff]  }
  0xa7   :  { %810 = vmatpush1.bf16.msra.mxu0 %v1655_v8  ;;  %841 = vmatprep.mubr.bf16.mxu0 %v1778_v11  ;;  %v1725_v8 = vld [vmem:[%s1954_s5 + $0x38] sm:$0xff]   ;;  %v903_v11 = vrot.slane %v894_v9, %v182_v33 }
  0xa9   :  { %1097 = vmatpush1.bf16.msra.mxu1 %v1707_v23 }
  0xaa   :  { %1472 = vmatprep.subr.bf16.mxu1 %v1710_v24 }
  0xb2   :  { %1413 = vmatmul.mubr.msk.bf16.vlgmr.msra.gmra.mrb[0].mxu0 %vm676_vm0, %v75_v15 }
 0x13f   :  { %v714_v25 = vpop.f32.mrb[0].mxu1 }
 0x140   :  { %v716_v26 = vpop.f32.mrb[1].mxu1  ;;  %v715_v36 = vadd.f32 %v714_v25, %v179_v34 }
 0x141   :  { %v718_v27 = vpop.f32.mrb[2].mxu1  ;;  %v717_v37 = vadd.f32 %v716_v26, %v183_v35 }
 0x142   :  { %v720_v28 = vpop.f32.mrb[3].mxu1  ;;  %v719_v39 = vadd.f32 %v718_v27, %v179_v34 }
 0x143   :  { %v721_v42 = vadd.f32 %v720_v28, %v183_v35 }
 0x185   :  { %v843_v38 = vpop.f32.mrb[0].mxu0 }
 0x186   :  { %v1495_v40 = vadd.f32 %v843_v38, %v715_v36  ;;  %v845_v41 = vpop.f32.mrb[1].mxu0 }
 0x187   :  { %v1497_v43 = vadd.f32 %v845_v41, %v717_v37  ;;  %v847_v44 = vpop.f32.mrb[2].mxu0 }
 0x188   :  { %v852_v45 = vmul.f32 0.01, %v1495_v40  ;;  %v1499_v46 = vadd.f32 %v847_v44, %v719_v39  ;;  %v849_v47 = vpop.f32.mrb[3].mxu0 }
 0x189   :  { %v853_v48 = vmul.f32 0.01, %v1497_v43  ;;  %v1501_v49 = vadd.f32 %v849_v47, %v721_v42 }
 0x18a   :  { %v854_v50 = vmul.f32 0.01, %v1499_v46  ;;  %v856_v52 = vmax.f32 %v1495_v40, %v852_v45 }
 0x18b   :  { %v855_v51 = vmul.f32 0.01, %v1501_v49  ;;  %v857_v54 = vmax.f32 %v1497_v43, %v853_v48 }
 0x18c   :  { %v858_v53 = vmax.f32 %v1499_v46, %v854_v50 }
 0x18d   :  { %v859_v55 = vmax.f32 %v1501_v49, %v855_v51 }
 0x18e   :  { %v860_v56 = vpack.c.bf16 %v858_v53, %v856_v52 }
 0x18f   :  { %v861_v57 = vpack.c.bf16 %v859_v55, %v857_v54 }
 0x191   :  { %1098 = vmatprep.mubr.bf16.mxu1 %v861_v57 }
 0x192   :  { %1099 = vmatmul.mubr.bf16.vlgmr.msra.gmra.mrb[4].mxu1 %v860_v56 }
 0x193   :  { %1473 = vmatpush3.bf16.msra.mxu1 %v1711_v58 }
 0x194   :  { %1474 = vmatprep.subr.bf16.mxu1 %v1712_v59 }
 0x197   :  { %1475 = vmatpush3.bf16.msra.mxu1 %v1713_v60 }
 0x198   :  { %1476 = vmatprep.subr.bf16.mxu1 %v1714_v61 }
 0x19b   :  { %1477 = vmatpush3.bf16.msra.mxu1 %v1715_v62 }
 0x19c   :  { %1478 = vmatprep.subr.bf16.mxu1 %v1716_v63 }
 0x19f   :  { %1479 = vmatpush3.bf16.msra.mxu1 %v1717_v0 }
 0x1a0   :  { %1480 = vmatprep.subr.bf16.mxu1 %v1718_v1 }
 0x1a3   :  { %1481 = vmatpush3.bf16.msra.mxu1 %v1719_v2 }
 0x1a4   :  { %1482 = vmatprep.subr.bf16.mxu1 %v1720_v3 }
 0x1a7   :  { %1483 = vmatpush3.bf16.msra.mxu1 %v1721_v4 }
 0x1a8   :  { %1484 = vmatprep.subr.bf16.mxu1 %v1722_v5 }
 0x1ab   :  { %1485 = vmatpush3.bf16.msra.mxu1 %v1723_v6 }
 0x1ac   :  { %1486 = vmatprep.subr.bf16.mxu1 %v1724_v7 }
 0x1af   :  { %1487 = vmatpush3.bf16.msra.mxu1 %v1725_v8 }
 0x265   :  { %v1100_v12 = vpop.f32.mrb[4].mxu1 }
 0x266   :  { %v1101_v13 = vadd.f32 %v1100_v12, %v899_v10  ;;  %v1102_v14 = vpop.f32.mrb[5].mxu1 }
 0x267   :  { %v1103_v15 = vadd.f32 %v1102_v14, %v903_v11  ;;  %v1104_v16 = vpop.f32.mrb[6].mxu1 }
 0x268   :  { %v1109_v17 = vmul.f32 0.01, %v1101_v13  ;;  %v1105_v18 = vadd.f32 %v1104_v16, %v899_v10  ;;  %v1106_v19 = vpop.f32.mrb[7].mxu1 }
 0x269   :  { %v1110_v20 = vmul.f32 0.01, %v1103_v15  ;;  %v1107_v21 = vadd.f32 %v1106_v19, %v903_v11 }
 0x26a   :  { %v1111_v22 = vmul.f32 0.01, %v1105_v18  ;;  %v1113_v24 = vmax.f32 %v1101_v13, %v1109_v17 }
 0x26b   :  { %v1112_v23 = vmul.f32 0.01, %v1107_v21  ;;  %v1114_v26 = vmax.f32 %v1103_v15, %v1110_v20 }
 0x26c   :  { %v1115_v25 = vmax.f32 %v1105_v18, %v1111_v22 }
 0x26d   :  { %v1116_v27 = vmax.f32 %v1107_v21, %v1112_v23 }
 0x26e   :  { %v1117_v28 = vpack.c.bf16 %v1115_v25, %v1113_v24 }
 0x26f   :  { %v1118_v29 = vpack.c.bf16 %v1116_v27, %v1114_v26 }
 0x271   :  { %1286 = vmatprep.mubr.bf16.mxu1 %v1118_v29 }
 0x272   :  { %1287 = vmatmul.mubr.bf16.vlgmr.msra.gmra.mrb[8].mxu1 %v1117_v28 }
 0x345   :  { %v1488_v30 = vpop.f32.mrb[8].mxu1 }
 0x346   :  { %v1489_v32 = vpop.f32.mrb[9].mxu1 }
 0x347   :  { %v1490_v33 = vadd.f32 %v1489_v32, %v1488_v30  ;;  %v1491_v34 = vpop.f32.mrb[10].mxu1 }
 0x348   :  { %v1492_v35 = vpop.f32.mrb[11].mxu1 }
 0x349   :  { %v1289_v36 = vadd.f32 %v1490_v33, %v1446_v31  ;;  %v1493_v37 = vadd.f32 %v1492_v35, %v1491_v34 }
 0x34b   :  { %v1295_v38 = vmul.f32 0.01, %v1289_v36  ;;  %v1292_v39 = vadd.f32 %v1493_v37, %v1446_v31 }
 0x34d   :  { %v1296_v40 = vmul.f32 0.01, %v1292_v39  ;;  %v1297_v41 = vmax.f32 %v1289_v36, %v1295_v38 }
 0x34f   :  { %v1298_v42 = vmax.f32 %v1292_v39, %v1296_v40 }
 0x351   :  { %v1470_v43 = vpack.c.bf16 %v1298_v42, %v1297_v41 }
 0x353   :  { %1471 = vst [vmem:[%s1956_s7] sm:$0xff] %v1470_v43  }
 0x354   :  { %1313 = vsyncpa [#allocation3], 1 }
 0x355   :  { %1314 = vsyncpa [#allocation5], 1 }

</bundles_post_ra>
